<compile_context>
chip_gen: v6e
topology: v6e:2x2x1
jax: 0.10.0
libtpu: 0.0.40
codegen_flags: <defaults>
</compile_context>

<pallas_src>
import functools

import numpy as np

import jax
import jax.numpy as jnp
from jax.experimental import pallas as pl
from jax.experimental.pallas import tpu as pltpu

_LANE = 128


# --------------------------------------------------------------------------- #
# Band matrix: replicate padding + stride baked in, exact integer counts.
# --------------------------------------------------------------------------- #
def _build_band_matrix(L, kernel_size, stride):
    pad = (kernel_size - 1) // 2
    L_pad = L + 2 * pad
    out_len = (L_pad - kernel_size) // stride + 1
    A = np.zeros((out_len, L), dtype=np.float32)
    for t in range(out_len):
        for j in range(kernel_size):
            src = t * stride + j - pad          # index into the un-padded x
            src = min(max(src, 0), L - 1)       # replicate padding == clamp
            A[t, src] += 1.0
    return A, out_len


# --------------------------------------------------------------------------- #
# Small tiling helpers (all static Python, run at trace time).
# --------------------------------------------------------------------------- #
def _round_up(n, m):
    return ((n + m - 1) // m) * m


def _largest_divisor_leq(n, cap):
    cap = max(1, min(n, cap))
    for d in range(cap, 0, -1):
        if n % d == 0:
            return d
    return 1


def _pick_lane_tile(width, max_tile):
    """Largest multiple-of-128 tile <= max_tile that divides `width`."""
    cap = max(_LANE, max_tile)
    for cand in (2048, 1024, 512, 256, 128):
        if cand <= cap and width % cand == 0:
            return cand
    return _LANE


def _vmem_limit(x_tile_bytes, o_tile_bytes, a_bytes):
    # Double-buffered x/out tiles + (default double-buffered) band matrix,
    # generous 2x headroom, capped at 48 MiB so it also fits v7x's 64 MiB VMEM.
    est = 2 * (x_tile_bytes + o_tile_bytes + a_bytes)
    return int(min(48 * 1024 * 1024, max(16 * 1024 * 1024, 2 * est)))


# --------------------------------------------------------------------------- #
# Kernels
# --------------------------------------------------------------------------- #
def _moving_avg_2d_kernel(a_ref, x_ref, o_ref, *, inv_k):
    # a_ref: (out_len, L)  integer-count band matrix
    # x_ref: (L, W_tile)   time-major, batch*channel folded onto lanes
    # o_ref: (out_len, W_tile)
    acc = jnp.dot(a_ref[...], x_ref[...], preferred_element_type=jnp.float32)
    o_ref[...] = (acc * inv_k).astype(o_ref.dtype)


def _moving_avg_3d_kernel(a_ref, x_ref, o_ref, *, inv_k, batch_block):
    # a_ref: (out_len, L)
    # x_ref: (Bt, L, c_tile)      Bt batch elements per grid step
    # o_ref: (Bt, out_len, c_tile)
    a = a_ref[...]
    for b in range(batch_block):  # small static unroll; each iter is one MXU matmul
        acc = jnp.dot(a, x_ref[b], preferred_element_type=jnp.float32)
        o_ref[b] = (acc * inv_k).astype(o_ref.dtype)


# --------------------------------------------------------------------------- #
# Wrapper
# --------------------------------------------------------------------------- #
def moving_avg(x, kernel_size, stride):
    """x: (B, L, C) -> (B, L_out, C), matching the PyTorch moving_avg module."""
    B, L, C = x.shape
    A_np, out_len = _build_band_matrix(L, kernel_size, stride)
    itemsize = jnp.dtype(x.dtype).itemsize

    # Integer counts are exactly representable in bf16 (<= 256), so bf16 inputs
    # keep the full-rate bf16 MXU path with no weight-quantization bias.
    if x.dtype == jnp.bfloat16 and float(A_np.max()) <= 256.0:
        a_dtype = jnp.bfloat16
    else:
        a_dtype = jnp.float32
    A = jnp.asarray(A_np, dtype=a_dtype)
    a_bytes = out_len * L * jnp.dtype(a_dtype).itemsize
    inv_k = 1.0 / float(kernel_size)

    # Accurate memory-bound cost hint: banded flops, single HBM pass of x/out.
    cost = pl.CostEstimate(
        flops=2 * B * out_len * kernel_size * C,
        transcendentals=0,
        bytes_accessed=(B * L * C + B * out_len * C) * itemsize + a_bytes,
    )

    target_tile_bytes = 2 * 1024 * 1024  # ~1-2 MiB x tile per grid step

    if C < _LANE:
        # ------- lane-dense fold path: (B, L, C) -> (L, B*C) ----------------
        BC = B * C
        x2d = jnp.transpose(x, (1, 0, 2)).reshape(L, BC)
        BC_pad = BC if BC <= _LANE else _round_up(BC, _LANE)
        if BC_pad != BC:
            x2d = jnp.pad(x2d, ((0, 0), (0, BC_pad - BC)))

        if BC_pad <= _LANE:
            w_tile = BC_pad
        else:
            max_tile = max(_LANE,
                           (target_tile_bytes // (L * itemsize)) // _LANE * _LANE)
            w_tile = _pick_lane_tile(BC_pad, max_tile)
            # keep >= 2 grid steps so megacore (v7x) can shard when possible
            if BC_pad // w_tile < 2 and w_tile > _LANE:
                w_tile = _pick_lane_tile(BC_pad, w_tile // 2)
        n_w = BC_pad // w_tile

        x_tile_bytes = L * w_tile * itemsize
        o_tile_bytes = out_len * w_tile * itemsize
        vmem_limit = _vmem_limit(x_tile_bytes, o_tile_bytes, a_bytes)

        out2d = pl.pallas_call(
            functools.partial(_moving_avg_2d_kernel, inv_k=inv_k),
            out_shape=jax.ShapeDtypeStruct((out_len, BC_pad), x.dtype),
            grid_spec=pltpu.PrefetchScalarGridSpec(
                num_scalar_prefetch=0,
                grid=(n_w,),
                in_specs=[
                    # Band matrix: same block at every step (stays resident).
                    pl.BlockSpec((out_len, L), lambda w: (0, 0)),
                    pl.BlockSpec((L, w_tile), lambda w: (0, w)),
                ],
                out_specs=pl.BlockSpec((out_len, w_tile), lambda w: (0, w)),
            ),
            compiler_params=pltpu.CompilerParams(
                dimension_semantics=("parallel",),
                vmem_limit_bytes=vmem_limit,
            ),
            cost_estimate=cost,
        )(A, x2d)

        out = out2d[:, :BC].reshape(out_len, B, C)
        return jnp.transpose(out, (1, 0, 2))

    # ------- channel-tiled, batch-blocked path (C >= 128) -------------------
    C_pad = _round_up(C, _LANE)
    x_in = x if C_pad == C else jnp.pad(x, ((0, 0), (0, 0), (0, C_pad - C)))

    max_tile = max(_LANE, (target_tile_bytes // (L * itemsize)) // _LANE * _LANE)
    c_tile = _pick_lane_tile(C_pad, max_tile)
    n_c = C_pad // c_tile

    # Batch block: fill the remaining per-step byte budget (divisor of B,
    # capped so the static unroll in the kernel stays small).
    bt_cap = max(1, target_tile_bytes // (L * c_tile * itemsize))
    bt = _largest_divisor_leq(B, min(B, bt_cap, 16))
    # keep >= 2 grid steps so megacore (v7x: 2 TCs) can shard
    if n_c * (B // bt) < 2 and bt > 1:
        bt = _largest_divisor_leq(B, bt // 2)
    n_b = B // bt

    x_tile_bytes = bt * L * c_tile * itemsize
    o_tile_bytes = bt * out_len * c_tile * itemsize
    vmem_limit = _vmem_limit(x_tile_bytes, o_tile_bytes, a_bytes)

    out = pl.pallas_call(
        functools.partial(_moving_avg_3d_kernel, inv_k=inv_k, batch_block=bt),
        out_shape=jax.ShapeDtypeStruct((B, out_len, C_pad), x.dtype),
        grid_spec=pltpu.PrefetchScalarGridSpec(
            num_scalar_prefetch=0,
            grid=(n_b, n_c),
            in_specs=[
                # Band matrix: same block at every grid point (stays resident).
                pl.BlockSpec((out_len, L), lambda b, c: (0, 0)),
                # Bt batch elements x one lane-dense channel tile per step.
                pl.BlockSpec((bt, L, c_tile), lambda b, c: (b, 0, c)),
            ],
            out_specs=pl.BlockSpec((bt, out_len, c_tile), lambda b, c: (b, 0, c)),
        ),
        compiler_params=pltpu.CompilerParams(
            dimension_semantics=("parallel", "parallel"),
            vmem_limit_bytes=vmem_limit,
        ),
        cost_estimate=cost,
    )(A, x_in)

    if C_pad != C:
        out = out[:, :, :C]
    return out


# --------------------------------------------------------------------------- #
# Pure-JAX reference matching the PyTorch module.
# --------------------------------------------------------------------------- #
def _reference_moving_avg(x, kernel_size, stride):
    B, L, C = x.shape
    pad = (kernel_size - 1) // 2
    front = jnp.broadcast_to(x[:, 0:1, :], (B, pad, C))
    end = jnp.broadcast_to(x[:, -1:, :], (B, pad, C))
    xp = jnp.concatenate([front, x, end], axis=1)
    L_pad = L + 2 * pad
    out_len = (L_pad - kernel_size) // stride + 1
    outs = [
        jnp.mean(xp[:, t * stride: t * stride + kernel_size, :], axis=1)
        for t in range(out_len)
    ]
    return jnp.stack(outs, axis=1)


if __name__ == "__main__":
    key = jax.random.PRNGKey(0)
    k1, k2, k3 = jax.random.split(key, 3)

    # Case 1: DLinear-typical shape, tiny channel count -> lane-dense fold path.
    B, L, C = 2, 96, 7
    ks, st = 25, 1
    x1 = jax.random.normal(k1, (B, L, C), dtype=jnp.float32)
    out1 = jax.block_until_ready(moving_avg(x1, ks, st))
    ref1 = _reference_moving_avg(x1, ks, st)
    assert out1.shape == ref1.shape, (out1.shape, ref1.shape)
    assert jnp.allclose(out1, ref1, atol=2e-5, rtol=1e-4), "case 1 mismatch"

    # Case 2: wide 128-aligned channel axis, stride 2 -> batch-blocked channel tiles.
    B, L, C = 4, 64, 256
    ks, st = 5, 2
    x2 = jax.random.normal(k2, (B, L, C), dtype=jnp.float32)
    out2 = jax.block_until_ready(moving_avg(x2, ks, st))
    ref2 = _reference_moving_avg(x2, ks, st)
    assert out2.shape == ref2.shape, (out2.shape, ref2.shape)
    assert jnp.allclose(out2, ref2, atol=2e-5, rtol=1e-4), "case 2 mismatch"

    # Case 3: C >= 128 but not a multiple of 128 -> explicit channel padding path.
    B, L, C = 2, 48, 192
    ks, st = 7, 1
    x3 = jax.random.normal(k3, (B, L, C), dtype=jnp.float32)
    out3 = jax.block_until_ready(moving_avg(x3, ks, st))
    ref3 = _reference_moving_avg(x3, ks, st)
    assert out3.shape == ref3.shape, (out3.shape, ref3.shape)
    assert jnp.allclose(out3, ref3, atol=2e-5, rtol=1e-4), "case 3 mismatch"

    # Case 4: bf16 input -> integer-count bf16 band matrix + f32 accumulation.
    x4 = x1.astype(jnp.bfloat16)
    out4 = jax.block_until_ready(moving_avg(x4, 25, 1))
    ref4 = _reference_moving_avg(x4.astype(jnp.float32), 25, 1)
    assert out4.shape == ref4.shape, (out4.shape, ref4.shape)
    assert jnp.allclose(out4.astype(jnp.float32), ref4, atol=3e-2, rtol=3e-2), "case 4 mismatch"

    print("KERNEL_OK")
</pallas_src>

<mosaic_0001>
module attributes {stable_mosaic.version = 11 : i64} {
  func.func @_moving_avg_2d_kernel(%arg0: i32, %arg1: memref<96x96xf32, #tpu.memory_space<vmem>>, %arg2: memref<96x14xf32, #tpu.memory_space<vmem>>, %arg3: memref<96x14xf32, #tpu.memory_space<vmem>>) attributes {dimension_semantics = [#tpu.dimension_semantics<parallel>], iteration_bounds = array<i64: 1>, scalar_prefetch = 0 : i64, scratch_operands = 0 : i64, tpu.core_type = #tpu.core_type<tc>, window_params = [{pipeline_mode = #tpu.pipeline_mode<synchronous>, transform_indices = @transform_0, window_bounds = array<i64: 96, 96>}, {transform_indices = @transform_1, window_bounds = array<i64: 96, 14>}, {transform_indices = @transform_2, window_bounds = array<i64: 96, 14>}]} {
    %c0 = arith.constant 0 : index
    %c0_0 = arith.constant 0 : index
    %0 = vector.load %arg1[%c0, %c0_0] : memref<96x96xf32, #tpu.memory_space<vmem>>, vector<96x96xf32>
    %c0_1 = arith.constant 0 : index
    %c0_2 = arith.constant 0 : index
    %1 = vector.load %arg2[%c0_1, %c0_2] : memref<96x14xf32, #tpu.memory_space<vmem>>, vector<96x14xf32>
    %cst = arith.constant dense<0.000000e+00> : vector<96x14xf32>
    %2 = tpu.matmul %0, %1, %cst {dimension_numbers = #tpu.dot_dimension_numbers<[1], [0], [0], [1], [0, 0, 1, 1], [], []>} : vector<96x96xf32>, vector<96x14xf32>, vector<96x14xf32> -> vector<96x14xf32>
    %cst_3 = arith.constant 4.000000e-02 : f32
    %3 = vector.broadcast %cst_3 : f32 to vector<96x14xf32>
    %4 = arith.mulf %2, %3 : vector<96x14xf32>
    %c0_4 = arith.constant 0 : index
    %c0_5 = arith.constant 0 : index
    %5 = vector.load %arg3[%c0_4, %c0_5] : memref<96x14xf32, #tpu.memory_space<vmem>>, vector<96x14xf32>
    tpu.vector_store %arg3[%c0_4, %c0_5], %4 {strides = array<i32>} : memref<96x14xf32, #tpu.memory_space<vmem>>, vector<96x14xf32>,
    return
  }
  func.func @transform_0(%arg0: i32) -> (i32, i32) {
    %c0_i32 = arith.constant 0 : i32
    %c0_i32_0 = arith.constant 0 : i32
    %c0_i32_1 = arith.constant 0 : i32
    return %c0_i32, %c0_i32_0 : i32, i32
  }
  func.func @transform_1(%arg0: i32) -> (i32, i32) {
    %c0_i32 = arith.constant 0 : i32
    %c0_i32_0 = arith.constant 0 : i32
    return %c0_i32, %arg0 : i32, i32
  }
  func.func @transform_2(%arg0: i32) -> (i32, i32) {
    %c0_i32 = arith.constant 0 : i32
    %c0_i32_0 = arith.constant 0 : i32
    return %c0_i32, %arg0 : i32, i32
  }
}

</mosaic_0001>

<bundles_post_ra>
// kernel: tpu_custom_call.1
= control target key start
LH: loop header
LB: loop body
LE: loop exit
PB: predicated region body
PF: predicated region fallthrough
CT: control target
= control target key end

     0   :  { %vm35_vm0 = vcmask 785408   ;;  %vm209_vm1 = vcmask 113664   ;;  %s475_s1 = inlined_call_operand.vmem [shape: f32[96,14], index: 1, kind: input, shape index: {}]   ;;  %s476_s0 = inlined_call_operand.vmem [shape: f32[96,96], index: 0, kind: input, shape index: {}]   ;;  %s477_s2 = inlined_call_operand.vmem [shape: f32[96,14], index: 2, kind: output, shape index: {}]  }
   0x1   :  { %v34_v0 = vld [vmem:[%s475_s1 + $0x58] sm:$0xff]  ;;  %v33_v1 = vld [vmem:[%s475_s1 + $0x50] sm:$0xff]  ;;  %v32_v2 = vld [vmem:[%s475_s1 + $0x48] sm:$0xff] }
   0x2   :  { %262 = vmatprep.subr.mxu0 %v34_v0  ;;  %304 = vmatprep.subr.mxu1 %v34_v0  ;;  %v31_v3 = vld [vmem:[%s475_s1 + $0x40] sm:$0xff]  ;;  %v30_v4 = vld [vmem:[%s475_s1 + $0x38] sm:$0xff]  ;;  %v29_v5 = vld [vmem:[%s475_s1 + $0x30] sm:$0xff] }
   0x3   :  { %263 = vmatpush3.msra.mxu0 %v34_v0  ;;  %316 = vmatpush3.msra.mxu1 %v34_v0  ;;  %v28_v6 = vld [vmem:[%s475_s1 + $0x28] sm:$0xff]  ;;  %v27_v7 = vld [vmem:[%s475_s1 + $0x20] sm:$0xff]  ;;  %v26_v8 = vld [vmem:[%s475_s1 + $0x18] sm:$0xff] }
   0x4   :  { %264 = vmatprep.subr.mxu0 %v33_v1  ;;  %305 = vmatprep.subr.mxu1 %v33_v1  ;;  %v25_v9 = vld [vmem:[%s475_s1 + $0x10] sm:$0xff]  ;;  %v24_v10 = vld [vmem:[%s475_s1 + $0x8] sm:$0xff]  ;;  %v23_v11 = vld [vmem:[%s475_s1] sm:$0xff] }
   0x5   :  { %265 = vmatpush3.msra.mxu0 %v33_v1  ;;  %317 = vmatpush3.msra.mxu1 %v33_v1  ;;  %v11_v12 = vld [vmem:[%s476_s0] sm:$0xff]  ;;  %v17_v13 = vld [vmem:[%s476_s0 + $0x30] sm:$0xff]  ;;  %v12_v14 = vld [vmem:[%s476_s0 + $0x8] sm:$0xff] }
   0x6   :  { %266 = vmatprep.subr.mxu0 %v32_v2  ;;  %306 = vmatprep.subr.mxu1 %v32_v2  ;;  %v18_v15 = vld [vmem:[%s476_s0 + $0x38] sm:$0xff]  ;;  %v13_v16 = vld [vmem:[%s476_s0 + $0x10] sm:$0xff]  ;;  %v19_v17 = vld [vmem:[%s476_s0 + $0x40] sm:$0xff] }
   0x7   :  { %267 = vmatpush3.msra.mxu0 %v32_v2  ;;  %318 = vmatpush3.msra.mxu1 %v32_v2  ;;  %v14_v18 = vld [vmem:[%s476_s0 + $0x18] sm:$0xff]  ;;  %v20_v19 = vld [vmem:[%s476_s0 + $0x48] sm:$0xff]  ;;  %v15_v20 = vld [vmem:[%s476_s0 + $0x20] sm:$0xff] }
   0x8   :  { %268 = vmatprep.subr.mxu0 %v31_v3  ;;  %307 = vmatprep.subr.mxu1 %v31_v3  ;;  %v21_v21 = vld [vmem:[%s476_s0 + $0x50] sm:$0xff]  ;;  %v16_v22 = vld [vmem:[%s476_s0 + $0x28] sm:$0xff]  ;;  %v22_v23 = vld [vmem:[%s476_s0 + $0x58] sm:$0xff] }
   0x9   :  { %269 = vmatpush3.msra.mxu0 %v31_v3  ;;  %319 = vmatpush3.msra.mxu1 %v31_v3 }
   0xa   :  { %270 = vmatprep.subr.mxu0 %v30_v4  ;;  %308 = vmatprep.subr.mxu1 %v30_v4 }
   0xb   :  { %271 = vmatpush3.msra.mxu0 %v30_v4  ;;  %320 = vmatpush3.msra.mxu1 %v30_v4 }
   0xc   :  { %272 = vmatprep.subr.mxu0 %v29_v5  ;;  %309 = vmatprep.subr.mxu1 %v29_v5 }
   0xd   :  { %273 = vmatpush3.msra.mxu0 %v29_v5  ;;  %321 = vmatpush3.msra.mxu1 %v29_v5 }
   0xe   :  { %274 = vmatprep.subr.mxu0 %v28_v6  ;;  %310 = vmatprep.subr.mxu1 %v28_v6 }
   0xf   :  { %275 = vmatpush3.msra.mxu0 %v28_v6  ;;  %322 = vmatpush3.msra.mxu1 %v28_v6 }
  0x10   :  { %276 = vmatprep.subr.mxu0 %v27_v7  ;;  %311 = vmatprep.subr.mxu1 %v27_v7 }
  0x11   :  { %277 = vmatpush3.msra.mxu0 %v27_v7  ;;  %323 = vmatpush3.msra.mxu1 %v27_v7 }
  0x12   :  { %278 = vmatprep.subr.mxu0 %v26_v8  ;;  %312 = vmatprep.subr.mxu1 %v26_v8 }
  0x13   :  { %279 = vmatpush3.msra.mxu0 %v26_v8  ;;  %324 = vmatpush3.msra.mxu1 %v26_v8 }
  0x14   :  { %280 = vmatprep.subr.mxu0 %v25_v9  ;;  %313 = vmatprep.subr.mxu1 %v25_v9 }
  0x15   :  { %281 = vmatpush3.msra.mxu0 %v25_v9  ;;  %325 = vmatpush3.msra.mxu1 %v25_v9 }
  0x16   :  { %282 = vmatprep.subr.mxu0 %v24_v10  ;;  %314 = vmatprep.subr.mxu1 %v24_v10 }
  0x17   :  { %283 = vmatpush3.msra.mxu0 %v24_v10  ;;  %326 = vmatpush3.msra.mxu1 %v24_v10 }
  0x18   :  { %284 = vmatprep.subr.mxu0 %v23_v11  ;;  %315 = vmatprep.subr.mxu1 %v23_v11 }
  0x19   :  { %285 = vmatpush3.msra.mxu0 %v23_v11  ;;  %327 = vmatpush3.msra.mxu1 %v23_v11 }
  0x1a   :  { %286 = vmatprep.mubr.msk.f32.mxu0 %vm35_vm0, %v11_v12  ;;  %295 = vmatprep.mubr.msk.f32.mxu1 %vm35_vm0, %v17_v13 }
  0x1b   :  { %287 = vmatmul.mubr.msk.f32.vlgmr.msra.gmra.mxu0 %vm35_vm0, %v12_v14  ;;  %296 = vmatmul.mubr.msk.f32.vlgmr.msra.gmra.mxu1 %vm35_vm0, %v18_v15 }
  0x1c   :  { %289 = vmatprep.mubr.msk.f32.mxu0 %vm35_vm0, %v13_v16  ;;  %298 = vmatprep.mubr.msk.f32.mxu1 %vm35_vm0, %v19_v17 }
  0x1f   :  { %290 = vmatmul.mubr.msk.f32.gmra.mxu0 %vm35_vm0, %v14_v18  ;;  %299 = vmatmul.mubr.msk.f32.gmra.mxu1 %vm35_vm0, %v20_v19 }
  0x20   :  { %292 = vmatprep.mubr.msk.f32.mxu0 %vm35_vm0, %v15_v20  ;;  %301 = vmatprep.mubr.msk.f32.mxu1 %vm35_vm0, %v21_v21 }
  0x23   :  { %293 = vmatmul.mubr.msk.f32.gmra.mxu0 %vm35_vm0, %v16_v22  ;;  %302 = vmatmul.mubr.msk.f32.gmra.mxu1 %vm35_vm0, %v22_v23 }
  0xdb   :  { %v288_v24 = vpop.f32.mrf.mxu0  ;;  %v297_v25 = vpop.f32.mrf.mxu1 }
  0xdc   :  { %v198_v26 = vmul.f32 0.04, %v288_v24  ;;  %v204_v27 = vmul.f32 0.04, %v297_v25 }
  0xdd   :  { %v138_v28 = vpop.f32.mrf.mxu0  ;;  %v168_v29 = vpop.f32.mrf.mxu1 }
  0xde   :  { %211 = vst.msk [vmem:[%s477_s2 + $0x8] sm:$0xff] %vm209_vm1, %v198_v26  ;;  %217 = vst.msk [vmem:[%s477_s2 + $0x38] sm:$0xff] %vm209_vm1, %v204_v27  ;;  %v197_v30 = vmul.f32 0.04, %v138_v28  ;;  %v203_v31 = vmul.f32 0.04, %v168_v29 }
  0xdf   :  { %v291_v32 = vpop.f32.mrf.mxu0  ;;  %v300_v33 = vpop.f32.mrf.mxu1 }
  0xe0   :  { %210 = vst.msk [vmem:[%s477_s2] sm:$0xff] %vm209_vm1, %v197_v30  ;;  %216 = vst.msk [vmem:[%s477_s2 + $0x30] sm:$0xff] %vm209_vm1, %v203_v31  ;;  %v200_v34 = vmul.f32 0.04, %v291_v32  ;;  %v206_v35 = vmul.f32 0.04, %v300_v33 }
  0xe1   :  { %v148_v36 = vpop.f32.mrf.mxu0  ;;  %v178_v37 = vpop.f32.mrf.mxu1 }
  0xe2   :  { %213 = vst.msk [vmem:[%s477_s2 + $0x18] sm:$0xff] %vm209_vm1, %v200_v34  ;;  %219 = vst.msk [vmem:[%s477_s2 + $0x48] sm:$0xff] %vm209_vm1, %v206_v35  ;;  %v199_v38 = vmul.f32 0.04, %v148_v36  ;;  %v205_v39 = vmul.f32 0.04, %v178_v37 }
  0xe3   :  { %v294_v40 = vpop.f32.mrf.mxu0  ;;  %v303_v41 = vpop.f32.mrf.mxu1 }
  0xe4   :  { %212 = vst.msk [vmem:[%s477_s2 + $0x10] sm:$0xff] %vm209_vm1, %v199_v38  ;;  %218 = vst.msk [vmem:[%s477_s2 + $0x40] sm:$0xff] %vm209_vm1, %v205_v39  ;;  %v202_v42 = vmul.f32 0.04, %v294_v40  ;;  %v208_v43 = vmul.f32 0.04, %v303_v41 }
  0xe5   :  { %v158_v44 = vpop.f32.mrf.mxu0  ;;  %v188_v45 = vpop.f32.mrf.mxu1 }
  0xe6   :  { %215 = vst.msk [vmem:[%s477_s2 + $0x28] sm:$0xff] %vm209_vm1, %v202_v42  ;;  %221 = vst.msk [vmem:[%s477_s2 + $0x58] sm:$0xff] %vm209_vm1, %v208_v43  ;;  %v201_v46 = vmul.f32 0.04, %v158_v44  ;;  %v207_v47 = vmul.f32 0.04, %v188_v45 }
  0xe8   :  { %214 = vst.msk [vmem:[%s477_s2 + $0x20] sm:$0xff] %vm209_vm1, %v201_v46  ;;  %220 = vst.msk [vmem:[%s477_s2 + $0x50] sm:$0xff] %vm209_vm1, %v207_v47 }

</bundles_post_ra>
